<compile_context>
chip_gen: v7x
topology: tpu7x:2x2x1
jax: 0.10.0
libtpu: 0.0.40
codegen_flags: <defaults>
</compile_context>

<pallas_src>
import functools

import jax
import jax.numpy as jnp
from jax.experimental import pallas as pl
from jax.experimental.pallas import tpu as pltpu

_MXU_DTYPE = jnp.bfloat16   # jnp.float32 for exact (slower on v6e/v7x) means


def _round_up(x, m):
    return ((x + m - 1) // m) * m


def _pick_tile_n(n):
    # lane-aligned point-tile width; >=128, <=512
    return min(512, max(128, _round_up(n, 128)))


def _pick_tile_m(m):
    # largest of {512, 256, 128} that keeps >=2 voxel tiles so both v7x
    # TensorCores get work; fall back to 128 for tiny voxel counts.
    for t in (512, 256, 128):
        if pl.cdiv(m, t) >= 2:
            return t
    return 128


def _scatter_mean_kernel(vmin_ref, vmax_ref, inv_ref, feat_ref, out_ref,
                         acc_ref, *, tile_m, c):
    i = pl.program_id(0)   # voxel tile   (parallel)
    k = pl.program_id(1)   # point tile   (reduction, last grid axis)

    @pl.when(k == 0)
    def _init():
        acc_ref[...] = jnp.zeros_like(acc_ref)

    # Skip (voxel tile, point tile) pairs that cannot overlap: points are
    # sorted by voxel id and vmin/vmax are scalar-prefetched per point tile.
    @pl.when(jnp.logical_and(i >= vmin_ref[k], i <= vmax_ref[k]))
    def _accumulate():
        inv = inv_ref[k]                      # (tile_n, 1)   int32
        feat = feat_ref[k]                    # (c+1, tile_n) _MXU_DTYPE (row c = ones)
        tile_n = inv.shape[0]
        vox = i * tile_m + jax.lax.broadcasted_iota(
            jnp.int32, (tile_n, tile_m), 1)
        onehot = (inv == vox).astype(feat.dtype)       # exact 0/1
        # segment-sum (+ fused count in row c) on the MXU, f32 accumulation
        acc_ref[...] += jnp.dot(feat, onehot,
                                preferred_element_type=jnp.float32)

    @pl.when(k == pl.num_programs(1) - 1)
    def _finalize():
        acc = acc_ref[...]
        cnt = acc[c:c + 1, :]                          # (1, tile_m) counts
        # count==0 only for padded voxel slots (sliced off by the wrapper)
        out_ref[...] = acc[:c, :] / jnp.maximum(cnt, 1.0)


def scatter_mean_pallas(features, unq_inv, num_voxels):
    """features: (N, C) f32, unq_inv: (N,) int32 in [0, num_voxels)."""
    N, C = features.shape

    # Sort points by voxel id so each point tile overlaps only 1-2 voxel
    # tiles (enables the in-kernel pl.when skip). scatter_mean is permutation
    # invariant, so the result is unchanged.
    order = jnp.argsort(unq_inv)
    inv_sorted = jnp.asarray(unq_inv, jnp.int32)[order]
    feat_sorted = features[order]

    tile_n = _pick_tile_n(N)
    tile_m = _pick_tile_m(num_voxels)
    n_pad = tile_n * pl.cdiv(N, tile_n)
    m_pad = tile_m * pl.cdiv(num_voxels, tile_m)
    n_tiles = n_pad // tile_n
    m_tiles = m_pad // tile_m

    # (C+1, n_pad) feature slab, transposed so voxels land on the lane axis of
    # the output; row C is all-ones -> the per-voxel count falls out of the
    # same matmul. Padded point columns are all-zero.
    feat_flat = jnp.zeros((C + 1, n_pad), _MXU_DTYPE)
    feat_flat = feat_flat.at[:C, :N].set(feat_sorted.T.astype(_MXU_DTYPE))
    feat_flat = feat_flat.at[C, :N].set(jnp.ones((N,), _MXU_DTYPE))
    # (n_tiles, C+1, tile_n): leading dim indexed dynamically in the kernel
    feat_p = feat_flat.reshape(C + 1, n_tiles, tile_n).transpose(1, 0, 2)

    # Per-point voxel id, padded with m_pad (never matches any voxel id).
    inv_flat = jnp.full((n_pad,), m_pad, jnp.int32).at[:N].set(inv_sorted)
    inv_p = inv_flat.reshape(n_tiles, tile_n, 1)

    # Scalar-prefetched per point tile: first / last voxel block it touches.
    blocks = inv_flat.reshape(n_tiles, tile_n)
    vmin = (blocks[:, 0] // tile_m).astype(jnp.int32)
    vmax = (blocks[:, -1] // tile_m).astype(jnp.int32)

    # VMEM budget: resident inputs (possibly double-buffered) + headroom for
    # the onehot tile, accumulator and output blocks. Stays well under the
    # 64 MiB v7x physical VMEM for typical point-cloud sizes.
    resident = (feat_p.size * jnp.dtype(_MXU_DTYPE).itemsize
                + inv_p.size * 4)
    vmem_limit = int(min(96 << 20, max(32 << 20, 2 * resident + (8 << 20))))

    kernel = functools.partial(_scatter_mean_kernel, tile_m=tile_m, c=C)
    out_t = pl.pallas_call(
        kernel,
        out_shape=jax.ShapeDtypeStruct((C, m_pad), jnp.float32),
        grid_spec=pltpu.PrefetchScalarGridSpec(
            num_scalar_prefetch=2,                       # vmin, vmax -> SMEM
            grid=(m_tiles, n_tiles),
            in_specs=[
                # whole arrays resident in VMEM (constant block index)
                pl.BlockSpec((n_tiles, tile_n, 1),
                             lambda i, k, vmin_sm, vmax_sm: (0, 0, 0)),
                pl.BlockSpec((n_tiles, C + 1, tile_n),
                             lambda i, k, vmin_sm, vmax_sm: (0, 0, 0)),
            ],
            out_specs=pl.BlockSpec((C, tile_m),
                                   lambda i, k, vmin_sm, vmax_sm: (0, i)),
            scratch_shapes=[pltpu.VMEM((C + 1, tile_m), jnp.float32)],
        ),
        compiler_params=pltpu.CompilerParams(
            dimension_semantics=("parallel", "arbitrary"),
            vmem_limit_bytes=vmem_limit),
    )(vmin, vmax, inv_p, feat_p)

    # lane-dense (C, m_pad) -> (num_voxels, C)
    return out_t[:, :num_voxels].T


def dynamic_voxel_encoder_v1(points, grid_ind):
    """JAX/Pallas equivalent of DynamicVoxelEncoderV1.forward.

    points:   (N, num_input_features) float32
    grid_ind: (N, 3) int32 voxel coordinates
    returns:  (voxel_features (M, C) float32, unq (M, 3) int32)
    """
    # TODO(synk): torch.unique is data-dependent in shape (dynamic voxel
    # count M); it has no clean Pallas equivalent and runs eagerly in plain
    # JAX here (as does the argsort-by-voxel preprocessing).
    unq, unq_inv, _ = jnp.unique(
        grid_ind, axis=0, return_inverse=True, return_counts=True)
    unq_inv = jnp.reshape(unq_inv, (-1,)).astype(jnp.int32)
    num_voxels = int(unq.shape[0])

    voxel_features = scatter_mean_pallas(
        points.astype(jnp.float32), unq_inv, num_voxels)
    return voxel_features, unq


def _reference_scatter_mean(points, grid_ind):
    unq, inv, cnt = jnp.unique(grid_ind, axis=0, return_inverse=True,
                               return_counts=True)
    inv = jnp.reshape(inv, (-1,))
    sums = jax.ops.segment_sum(points, inv, num_segments=unq.shape[0])
    return sums / cnt[:, None].astype(jnp.float32), unq


if __name__ == "__main__":
    k1, k2, k3, k4 = jax.random.split(jax.random.PRNGKey(0), 4)
    C = 7                 # num_input_features (module default)

    # ---- small case (single voxel/point tile) ----
    N = 64
    points = jax.random.normal(k1, (N, C), dtype=jnp.float32)
    grid_ind = jax.random.randint(k2, (N, 3), 0, 4, dtype=jnp.int32)

    feats, unq = dynamic_voxel_encoder_v1(points, grid_ind)
    feats = jax.block_until_ready(feats)
    unq = jax.block_until_ready(unq)

    means_ref, unq_ref = _reference_scatter_mean(points, grid_ind)
    assert feats.shape == (unq.shape[0], C)
    assert jnp.array_equal(unq, unq_ref)
    # MXU operands are bf16 (f32 accumulation) -> loosened tolerance vs f32 ref
    assert jnp.allclose(feats, means_ref, atol=5e-2, rtol=5e-2)

    # ---- larger case: multiple voxel & point tiles, exercises the
    #      scalar-prefetch tile-skip path ----
    N2 = 2048
    points2 = jax.random.normal(k3, (N2, C), dtype=jnp.float32)
    grid_ind2 = jax.random.randint(k4, (N2, 3), 0, 8, dtype=jnp.int32)

    feats2, unq2 = dynamic_voxel_encoder_v1(points2, grid_ind2)
    feats2 = jax.block_until_ready(feats2)

    means_ref2, unq_ref2 = _reference_scatter_mean(points2, grid_ind2)
    assert feats2.shape == (unq2.shape[0], C)
    assert jnp.array_equal(unq2, unq_ref2)
    assert jnp.allclose(feats2, means_ref2, atol=5e-2, rtol=5e-2)

    print("KERNEL_OK")
</pallas_src>

<mosaic_0001>
module attributes {stable_mosaic.version = 11 : i64} {
  func.func @_scatter_mean_kernel(%arg0: i32, %arg1: i32, %arg2: memref<1xi32, #tpu.memory_space<smem>>, %arg3: memref<1xi32, #tpu.memory_space<smem>>, %arg4: memref<1x128x1xi32, #tpu.memory_space<vmem>>, %arg5: memref<1x8x128xbf16, #tpu.memory_space<vmem>>, %arg6: memref<7x128xf32, #tpu.memory_space<vmem>>, %arg7: memref<8x128xf32, #tpu.memory_space<vmem>>) attributes {dimension_semantics = [#tpu.dimension_semantics<parallel>, #tpu.dimension_semantics<arbitrary>], iteration_bounds = array<i64: 1, 1>, scalar_prefetch = 2 : i64, scratch_operands = 1 : i64, tpu.core_type = #tpu.core_type<tc>, window_params = [{pipeline_mode = #tpu.pipeline_mode<synchronous>, transform_indices = @transform_0, window_bounds = array<i64: 1, 128, 1>}, {pipeline_mode = #tpu.pipeline_mode<synchronous>, transform_indices = @transform_1, window_bounds = array<i64: 1, 8, 128>}, {transform_indices = @transform_2, window_bounds = array<i64: 7, 128>}]} {
    %c0_i32 = arith.constant 0 : i32
    %0 = arith.cmpi eq, %arg1, %c0_i32 : i32
    %1 = arith.extui %0 : i1 to i32
    %c0_i32_0 = arith.constant 0 : i32
    %2 = arith.cmpi ne, %1, %c0_i32_0 : i32
    scf.if %2 {
      %cst = arith.constant 0.000000e+00 : f32
      %15 = vector.broadcast %cst : f32 to vector<8x128xf32>
      %c0 = arith.constant 0 : index
      %c0_4 = arith.constant 0 : index
      %16 = vector.load %arg7[%c0, %c0_4] : memref<8x128xf32, #tpu.memory_space<vmem>>, vector<8x128xf32>
      tpu.vector_store %arg7[%c0, %c0_4], %15 {strides = array<i32>} : memref<8x128xf32, #tpu.memory_space<vmem>>, vector<8x128xf32>,
    } else {
    }
    %3 = arith.index_cast %arg1 : i32 to index
    %4 = memref.load %arg2[%3] : memref<1xi32, #tpu.memory_space<smem>>
    %5 = arith.cmpi sge, %arg0, %4 : i32
    %6 = arith.index_cast %arg1 : i32 to index
    %7 = memref.load %arg3[%6] : memref<1xi32, #tpu.memory_space<smem>>
    %8 = arith.cmpi sle, %arg0, %7 : i32
    %9 = arith.andi %5, %8 : i1
    %10 = arith.extui %9 : i1 to i32
    %c0_i32_1 = arith.constant 0 : i32
    %11 = arith.cmpi ne, %10, %c0_i32_1 : i32
    scf.if %11 {
      %15 = arith.index_cast %arg1 : i32 to index
      %c0 = arith.constant 0 : index
      %c0_4 = arith.constant 0 : index
      %16 = vector.load %arg4[%15, %c0, %c0_4] : memref<1x128x1xi32, #tpu.memory_space<vmem>>, vector<1x128x1xi32>
      %17 = vector.shape_cast %16 : vector<1x128x1xi32> to vector<128x1xi32>
      %18 = arith.index_cast %arg1 : i32 to index
      %c0_5 = arith.constant 0 : index
      %c0_6 = arith.constant 0 : index
      %19 = vector.load %arg5[%18, %c0_5, %c0_6] : memref<1x8x128xbf16, #tpu.memory_space<vmem>>, vector<1x8x128xbf16>
      %20 = vector.shape_cast %19 : vector<1x8x128xbf16> to vector<8x128xbf16>
      %c128_i32 = arith.constant 128 : i32
      %21 = arith.muli %arg0, %c128_i32 : i32
      %22 = tpu.iota {dimensions = array<i32: 1>} : vector<128x128xi32>
      %23 = vector.broadcast %21 : i32 to vector<128x128xi32>
      %24 = arith.addi %23, %22 : vector<128x128xi32>
      %25 = vector.broadcast %17 : vector<128x1xi32> to vector<128x128xi32>
      %26 = arith.cmpi eq, %25, %24 : vector<128x128xi32>
      %27 = arith.extui %26 : vector<128x128xi1> to vector<128x128xi32>
      %28 = arith.sitofp %27 : vector<128x128xi32> to vector<128x128xf32>
      %29 = arith.truncf %28 : vector<128x128xf32> to vector<128x128xbf16>
      %c0_7 = arith.constant 0 : index
      %c0_8 = arith.constant 0 : index
      %30 = vector.load %arg7[%c0_7, %c0_8] : memref<8x128xf32, #tpu.memory_space<vmem>>, vector<8x128xf32>
      %cst = arith.constant dense<0.000000e+00> : vector<8x128xf32>
      %31 = tpu.matmul %20, %29, %cst {dimension_numbers = #tpu.dot_dimension_numbers<[1], [0], [0], [1], [0, 0, 1, 1], [], []>} : vector<8x128xbf16>, vector<128x128xbf16>, vector<8x128xf32> -> vector<8x128xf32>
      %32 = arith.addf %30, %31 : vector<8x128xf32>
      %c0_9 = arith.constant 0 : index
      %c0_10 = arith.constant 0 : index
      %33 = vector.load %arg7[%c0_9, %c0_10] : memref<8x128xf32, #tpu.memory_space<vmem>>, vector<8x128xf32>
      tpu.vector_store %arg7[%c0_9, %c0_10], %32 {strides = array<i32>} : memref<8x128xf32, #tpu.memory_space<vmem>>, vector<8x128xf32>,
    } else {
    }
    %c0_i32_2 = arith.constant 0 : i32
    %12 = arith.cmpi eq, %arg1, %c0_i32_2 : i32
    %13 = arith.extui %12 : i1 to i32
    %c0_i32_3 = arith.constant 0 : i32
    %14 = arith.cmpi ne, %13, %c0_i32_3 : i32
    scf.if %14 {
      %c0 = arith.constant 0 : index
      %c0_4 = arith.constant 0 : index
      %15 = vector.load %arg7[%c0, %c0_4] : memref<8x128xf32, #tpu.memory_space<vmem>>, vector<8x128xf32>
      %16 = vector.extract_strided_slice %15 {offsets = [7, 0], sizes = [1, 128], strides = [1, 1]} : vector<8x128xf32> to vector<1x128xf32>
      %17 = vector.extract_strided_slice %15 {offsets = [0, 0], sizes = [7, 128], strides = [1, 1]} : vector<8x128xf32> to vector<7x128xf32>
      %cst = arith.constant 1.000000e+00 : f32
      %18 = vector.broadcast %cst : f32 to vector<1x128xf32>
      %19 = arith.maximumf %16, %18 : vector<1x128xf32>
      %20 = vector.broadcast %19 : vector<1x128xf32> to vector<7x128xf32>
      %21 = arith.divf %17, %20 : vector<7x128xf32>
      %c0_5 = arith.constant 0 : index
      %c0_6 = arith.constant 0 : index
      %22 = vector.load %arg6[%c0_5, %c0_6] : memref<7x128xf32, #tpu.memory_space<vmem>>, vector<7x128xf32>
      tpu.vector_store %arg6[%c0_5, %c0_6], %21 {strides = array<i32>} : memref<7x128xf32, #tpu.memory_space<vmem>>, vector<7x128xf32>,
    } else {
    }
    return
  }
  func.func @transform_0(%arg0: i32, %arg1: i32, %arg2: memref<1xi32, #tpu.memory_space<smem>>, %arg3: memref<1xi32, #tpu.memory_space<smem>>) -> (i32, i32, i32) {
    %c0_i32 = arith.constant 0 : i32
    %c0_i32_0 = arith.constant 0 : i32
    %c0_i32_1 = arith.constant 0 : i32
    %c0_i32_2 = arith.constant 0 : i32
    return %c0_i32, %c0_i32_0, %c0_i32_1 : i32, i32, i32
  }
  func.func @transform_1(%arg0: i32, %arg1: i32, %arg2: memref<1xi32, #tpu.memory_space<smem>>, %arg3: memref<1xi32, #tpu.memory_space<smem>>) -> (i32, i32, i32) {
    %c0_i32 = arith.constant 0 : i32
    %c0_i32_0 = arith.constant 0 : i32
    %c0_i32_1 = arith.constant 0 : i32
    %c0_i32_2 = arith.constant 0 : i32
    return %c0_i32, %c0_i32_0, %c0_i32_1 : i32, i32, i32
  }
  func.func @transform_2(%arg0: i32, %arg1: i32, %arg2: memref<1xi32, #tpu.memory_space<smem>>, %arg3: memref<1xi32, #tpu.memory_space<smem>>) -> (i32, i32) {
    %c0_i32 = arith.constant 0 : i32
    %c0_i32_0 = arith.constant 0 : i32
    return %c0_i32, %arg0 : i32, i32
  }
}

</mosaic_0001>

<bundles_post_ra>
// kernel: tpu_custom_call.1
= control target key start
LH: loop header
LB: loop body
LE: loop exit
PB: predicated region body
PF: predicated region fallthrough
CT: control target
= control target key end

     0   :  { %11 = vsyncpa [#allocation7], 0  ;;  %v324_v0 = vmov 0.0   ;;  %s433_s0 = inlined_call_operand.<no memory space> [shape: s32[1], index: 0, kind: input, shape index: {}]   ;;  %s434_s1 = inlined_call_operand.<no memory space> [shape: s32[1], index: 1, kind: input, shape index: {}]   ;;  %s435_s2 = inlined_call_operand.vmem [shape: s32[1,128,1], index: 2, kind: input, shape index: {}]   ;;  %s436_s3 = inlined_call_operand.vmem [shape: bf16[1,8,128], index: 3, kind: input, shape index: {}]   ;;  %s437_s4 = inlined_call_operand.hbm [shape: f32[7,128], index: 4, kind: output, shape index: {}]  }
   0x1   :  { %p227_p0 = scmp.le.s32.totalorder %s433_s0, 0  ;;  %p228_p1 = scmp.ge.s32.totalorder %s434_s1, 0  ;;  %21 = vst [vmem:[#allocation2] sm:$0xff] %v324_v0 }
   0x3   :  { %p26_p2 = pnand %p228_p1, %p227_p0 }
   0x4   :  { %v34_v1 = vld [vmem:[%s435_s2 + $0x10] sm:$0xff] (!%p26_p2)  ;;  %v32_v2 = vld [vmem:[%s435_s2] sm:$0xff] (!%p26_p2)  ;;  %v325_v3 = vmov (!%p26_p2), 0   ;;  %v35_v4 = vld [vmem:[%s435_s2 + $0x18] sm:$0xff] (!%p26_p2)  ;;  %v326_v8 = vmov (!%p26_p2), 0.0   ;;  %vm327_vm0 = vmmov (!%p26_p2), 0   ;;  %v50_v19 = vlaneseq (!%p26_p2) }
   0x5   :  { %29 = sbr.rel (%p26_p2) target bundleno = 386 (0x182), region = 17  ;;  %297 = vset.pattern.permute.xlu1 (!%p26_p2), %v325_v3  ;;  %296 = vset.pattern.permute.xlu0 (!%p26_p2), %v325_v3  ;;  %v33_v5 = vld [vmem:[%s435_s2 + $0x8] sm:$0xff] (!%p26_p2)  ;;  %v36_v7 = vld [vmem:[%s435_s2 + $0x20] sm:$0xff] (!%p26_p2)  ;;  %v39_v9 = vld [vmem:[%s435_s2 + $0x38] sm:$0xff] (!%p26_p2)  ;;  %v328_v25 = vmov (!%p26_p2), 1.0|1.0  }
   0x6   :  { %61 = vperm.xlu1 (!%p26_p2), %297, %v34_v1   ;;  %55 = vperm.xlu0 (!%p26_p2), %296, %v32_v2   ;;  %v37_v6 = vld [vmem:[%s435_s2 + $0x28] sm:$0xff] (!%p26_p2)  ;;  %v38_v10 = vld [vmem:[%s435_s2 + $0x30] sm:$0xff] (!%p26_p2)  ;;  %v40_v12 = vld [vmem:[%s435_s2 + $0x40] sm:$0xff] (!%p26_p2)  ;;  %v51_v22 = vand.u32 (!%p26_p2), 127, %v50_v19 }
   0x7   :  { %270 = vmatprep.subr.bf16.mxu0 (!%p26_p2), %v326_v8  ;;  %v41_v11 = vld [vmem:[%s435_s2 + $0x48] sm:$0xff] (!%p26_p2)  ;;  %v43_v13 = vld [vmem:[%s435_s2 + $0x58] sm:$0xff] (!%p26_p2)  ;;  %v42_v14 = vld [vmem:[%s435_s2 + $0x50] sm:$0xff] (!%p26_p2)  ;;  %286 = vmatprep.mubr.msk.bf16.mxu0 (!%p26_p2), %vm327_vm0, %v326_v8 }
   0x8   :  { %v45_v15 = vld [vmem:[%s435_s2 + $0x68] sm:$0xff] (!%p26_p2)  ;;  %v44_v16 = vld [vmem:[%s435_s2 + $0x60] sm:$0xff] (!%p26_p2)  ;;  %v47_v17 = vld [vmem:[%s435_s2 + $0x78] sm:$0xff] (!%p26_p2) }
   0x9   :  { %v46_v18 = vld [vmem:[%s435_s2 + $0x70] sm:$0xff] (!%p26_p2)  ;;  %v48_v38 = vld [vmem:[%s436_s3] sm:$0xf] (!%p26_p2) }
   0xa   :  { %64 = vperm.xlu1 (!%p26_p2), %297, %v35_v4   ;;  %58 = vperm.xlu0 (!%p26_p2), %296, %v33_v5   ;;  %v158_v39 = vld [vmem:[#allocation2] sm:$0xff] (!%p26_p2) }
   0xe   :  { %70 = vperm.xlu1 %297, %v37_v6   ;;  %67 = vperm.xlu0 %296, %v36_v7  }
  0x12   :  { %76 = vperm.xlu1 %297, %v39_v9   ;;  %73 = vperm.xlu0 %296, %v38_v10  }
  0x16   :  { %82 = vperm.xlu1 %297, %v41_v11   ;;  %79 = vperm.xlu0 %296, %v40_v12  }
  0x1a   :  { %88 = vperm.xlu1 %297, %v43_v13   ;;  %85 = vperm.xlu0 %296, %v42_v14  }
  0x1e   :  { %94 = vperm.xlu1 %297, %v45_v15   ;;  %91 = vperm.xlu0 %296, %v44_v16  }
  0x22   :  { %100 = vperm.xlu1 %297, %v47_v17   ;;  %97 = vperm.xlu0 %296, %v46_v18  }
  0x85   :  { %v62_v20 = vpop.permute.xlu1 %61  ;;  %v56_v21 = vpop.permute.xlu0 %55 }
  0x86   :  { %vm102_vm2 = vcmp.eq.s32.totalorder %v56_v21, %v51_v22  ;;  %vm104_vm4 = vcmp.eq.s32.totalorder %v62_v20, %v51_v22 }
  0x89   :  { %v65_v23 = vpop.permute.xlu1 %64  ;;  %v59_v24 = vpop.permute.xlu0 %58 }
  0x8a   :  { %vm103_vm1 = vcmp.eq.s32.totalorder %v59_v24, %v51_v22  ;;  %vm105_vm5 = vcmp.eq.s32.totalorder %v65_v23, %v51_v22 }
  0x8b   :  { %vm245_vm3 = vmpackc.low %vm103_vm1, %vm102_vm2 }
  0x8c   :  { %271 = vmatpush3.bf16.msk.msra.mxu0 %vm245_vm3, %v328_v25  ;;  %vm247_vm6 = vmpackc.low %vm105_vm5, %vm104_vm4 }
  0x8d   :  { %v71_v26 = vpop.permute.xlu1 %70  ;;  %v68_v27 = vpop.permute.xlu0 %67  ;;  %272 = vmatprep.subr.bf16.mxu0 %v326_v8 }
  0x8e   :  { %vm107_vm7 = vcmp.eq.s32.totalorder %v71_v26, %v51_v22  ;;  %vm106_vm8 = vcmp.eq.s32.totalorder %v68_v27, %v51_v22 }
  0x8f   :  { %vm249_vm9 = vmpackc.low %vm107_vm7, %vm106_vm8 }
  0x90   :  { %273 = vmatpush3.bf16.msk.msra.mxu0 %vm247_vm6, %v328_v25 }
  0x91   :  { %v77_v28 = vpop.permute.xlu1 %76  ;;  %v74_v29 = vpop.permute.xlu0 %73  ;;  %274 = vmatprep.subr.bf16.mxu0 %v326_v8 }
  0x92   :  { %vm109_vm10 = vcmp.eq.s32.totalorder %v77_v28, %v51_v22  ;;  %vm108_vm11 = vcmp.eq.s32.totalorder %v74_v29, %v51_v22 }
  0x93   :  { %vm251_vm12 = vmpackc.low %vm109_vm10, %vm108_vm11 }
  0x94   :  { %275 = vmatpush3.bf16.msk.msra.mxu0 %vm249_vm9, %v328_v25 }
  0x95   :  { %v83_v30 = vpop.permute.xlu1 %82  ;;  %v80_v31 = vpop.permute.xlu0 %79  ;;  %276 = vmatprep.subr.bf16.mxu0 %v326_v8 }
  0x96   :  { %vm111_vm13 = vcmp.eq.s32.totalorder %v83_v30, %v51_v22  ;;  %vm110_vm14 = vcmp.eq.s32.totalorder %v80_v31, %v51_v22 }
  0x97   :  { %vm253_vm15 = vmpackc.low %vm111_vm13, %vm110_vm14 }
  0x98   :  { %277 = vmatpush3.bf16.msk.msra.mxu0 %vm251_vm12, %v328_v25 }
  0x99   :  { %v89_v32 = vpop.permute.xlu1 %88  ;;  %v86_v33 = vpop.permute.xlu0 %85  ;;  %278 = vmatprep.subr.bf16.mxu0 %v326_v8 }
  0x9a   :  { %vm113_vm0 = vcmp.eq.s32.totalorder %v89_v32, %v51_v22  ;;  %vm112_vm1 = vcmp.eq.s32.totalorder %v86_v33, %v51_v22 }
  0x9b   :  { %vm255_vm2 = vmpackc.low %vm113_vm0, %vm112_vm1 }
  0x9c   :  { %279 = vmatpush3.bf16.msk.msra.mxu0 %vm253_vm15, %v328_v25 }
  0x9d   :  { %v95_v34 = vpop.permute.xlu1 %94  ;;  %v92_v35 = vpop.permute.xlu0 %91  ;;  %280 = vmatprep.subr.bf16.mxu0 %v326_v8 }
  0x9e   :  { %vm115_vm3 = vcmp.eq.s32.totalorder %v95_v34, %v51_v22  ;;  %vm114_vm4 = vcmp.eq.s32.totalorder %v92_v35, %v51_v22 }
  0x9f   :  { %vm257_vm5 = vmpackc.low %vm115_vm3, %vm114_vm4 }
  0xa0   :  { %281 = vmatpush3.bf16.msk.msra.mxu0 %vm255_vm2, %v328_v25 }
  0xa1   :  { %v101_v36 = vpop.permute.xlu1 %100  ;;  %v98_v37 = vpop.permute.xlu0 %97  ;;  %282 = vmatprep.subr.bf16.mxu0 %v326_v8 }
  0xa2   :  { %vm117_vm6 = vcmp.eq.s32.totalorder %v101_v36, %v51_v22  ;;  %vm116_vm7 = vcmp.eq.s32.totalorder %v98_v37, %v51_v22 }
  0xa3   :  { %vm259_vm8 = vmpackc.low %vm117_vm6, %vm116_vm7 }
  0xa4   :  { %283 = vmatpush3.bf16.msk.msra.mxu0 %vm257_vm5, %v328_v25 }
  0xa5   :  { %284 = vmatprep.subr.bf16.mxu0 %v326_v8 }
  0xa8   :  { %285 = vmatpush3.bf16.msk.msra.mxu0 %vm259_vm8, %v328_v25 }
  0xab   :  { %287 = vmatmul.mubr.bf16.vlgmr.msra.gmra.mrb[0].mxu0 %v48_v38 }
 0x17e   :  { %v193_v40 = vpop.f32.mrb[0].mxu0 }
 0x17f   :  { %v199_v41 = vadd.f32 %v193_v40, %v158_v39  ;;  %v288_v42 = vpop.f32.mrb[1].mxu0 }
 0x180   :  { %v196_v43 = vpop.f32.mrb[2].mxu0 }
 0x181   :  { %200 = vst [vmem:[#allocation2] sm:$0xff] %v199_v41  ;;  %v289_v44 = vpop.f32.mrb[3].mxu0 }
 0x182 PF:  { %v206_v46 = vlaneseq  ;;  %s329_s23 = smov [#allocation6]  }
 0x183   :  { %s219_s1 = sshll.u32 %s329_s23, 4  ;;  %s220_s1 = int_to_ptr.vmem [resolvable:$true] %s219_s1 }
 0x184   :  { %v207_v48 = vshrl.u32 %v206_v46, 7  ;;  %s300_s3 = scalar_lea.vmem %s220_s1, 128  ;;  %p305_p4 = scmp.lt.s32.totalorder %s220_s1, %s220_s1 }
 0x185   :  { %p301_p3 = scmp.ne.s32.totalorder %s220_s1, %s300_s3  ;;  %p306_p5 = scmp.lt.s32.totalorder %s300_s3, %s300_s3 }
 0x186   :  { %v208_v49 = vsub.s32 7, %v207_v48 }
 0x187   :  { %p307_p6 = por %p306_p5, %p305_p4 }
 0x188   :  { %v204_v45 = vld [vmem:[#allocation2] sm:$0xff] }
 0x189   :  { %v205_v47 = vmax.f32 %v204_v45, 1.0  ;;  %p308_p7 = pnand %p307_p6, %p301_p3 }
 0x18b   :  { %v209_v50 = vrot.slane %v205_v47, %v208_v49 }
 0x18d   :  { %298 = vrcp.f32 %v209_v50 }
 0x197   :  { %v299_v51 = vpop.eup %298 }
 0x198   :  { %v211_v52 = vmul.f32 %v299_v51, %v204_v45 }
 0x19a   :  { %212 = vst [vmem:[#allocation6] sm:$0x7f] %v211_v52 }
 0x19b   :  { %311 = shalt.err (!%p308_p7)
}
 0x19c   :  { %s312_s26 = scalar_lea.hbm %s437_s4, 128 }
 0x19d   :  { %p313_p8 = scmp.ne.s32.totalorder %s437_s4, %s312_s26  ;;  %p316_p9 = scmp.lt.u32.totalorder %s312_s26, %s437_s4 }
 0x19f   :  { %p318_p10 = pnand %p316_p9, %p313_p8 }
 0x1a1   :  { %321 = shalt.err (!%p318_p10)
}
 0x1a2   :  { %222 = dma.vmem_to_hbm [thread:$0]  %s220_s1, 128, %s437_s4, [#allocation7]  }
 0x1a3   :  { %322 = dma.done.wait [#allocation7], 128  }
 0x1a4   :  { %323 = vsyncadd [#allocation7], 4294967168 }
 0x1a5   :  { %226 = vsyncpa [#allocation7], 1 }

</bundles_post_ra>
